<compile_context>
chip_gen: v6e
topology: v6e:2x2x1
jax: 0.10.0
libtpu: 0.0.40
codegen_flags: <defaults>
</compile_context>

<pallas_src>
import math

import jax
import jax.numpy as jnp
from jax.experimental import pallas as pl
from jax.experimental.pallas import tpu as pltpu


# --------------------------------------------------------------------------------------
# Kernel
# --------------------------------------------------------------------------------------
def _rk4_ssm_kernel(state_ref, x_ref, p_ref, q_ref, y_ref):
    """One (batch_tile, d_inner_tile) output tile:
         y = sum_n P[n, :] * state[:, n, :]  +  q * x        (lane-dense over d_inner)
    """
    acc = x_ref[...].astype(jnp.float32) * q_ref[...].astype(jnp.float32)   # (bt, dt)
    # Unrolled accumulation over the small d_state axis: whole-vreg VALU FMAs,
    # one live accumulator, no broadcast product / XLU reduce.
    for n in range(state_ref.shape[1]):
        acc = acc + (state_ref[:, n, :].astype(jnp.float32)
                     * p_ref[n, :].astype(jnp.float32))
    y_ref[...] = acc.astype(y_ref.dtype)


# --------------------------------------------------------------------------------------
# Closed-form RK4 coefficients (parameter-sized work, computed once per call in f32)
# --------------------------------------------------------------------------------------
def _rk4_output_coefficients(A, B, C, D, dt_proj):
    A = A.astype(jnp.float32)
    B = B.astype(jnp.float32)
    C = C.astype(jnp.float32)
    D = D.astype(jnp.float32)
    dt = jax.nn.softplus(dt_proj.astype(jnp.float32))[:, None]        # (d_inner, 1)
    z = A * dt                                                        # (d_inner, d_state)
    S = dt * (1.0 + z * (0.5 + z * (1.0 / 6.0 + z * (1.0 / 24.0))))
    P = (1.0 + S * A) * C                                             # (d_inner, d_state)
    q = jnp.sum(S * B * C, axis=1) + D                                # (d_inner,)
    return P, q


# --------------------------------------------------------------------------------------
# Generation-aware tiling
# --------------------------------------------------------------------------------------
def _vmem_budget_bytes():
    """Double-buffered footprint budget, safe on every generation:
       v5e/v6e have 128 MiB physical VMEM, v7x 64 MiB per TensorCore."""
    try:
        cap = pltpu.get_tpu_info().vmem_capacity_bytes
    except Exception:
        cap = 64 << 20
    return max(12 << 20, min(24 << 20, cap // 3))


def _choose_tiles(batch, d_inner, d_state, itemsize, budget):
    """Pick (batch_tile, d_inner_tile).  Prefers a large multiple-of-128 lane tile and
    splits the batch axis (in (8,128)-legal chunks) before shrinking the lane tile."""
    # Lane-axis candidates: multiple-of-128 divisors of d_inner, largest first.
    di_cands = sorted((d for d in range(128, d_inner + 1, 128) if d_inner % d == 0),
                      reverse=True)
    if not di_cands:
        di_cands = [d_inner]                 # small / odd d_inner: full-dim block
    elif len(di_cands) > 1 and di_cands[0] == d_inner:
        di_cands = di_cands[1:]              # guarantee >=2 grid steps (v7x megacore)

    # Batch (sublane) tiles: full batch, or multiples of 8 dividing it ((8,128) rule).
    bt_cands = sorted({batch} | {d for d in range(8, batch + 1, 8) if batch % d == 0},
                      reverse=True)

    def footprint(bt, dt):
        # Double-buffered per-step tiles: state + x + y, plus the small f32 P/q tiles.
        return (2 * itemsize * (bt * d_state * dt + 2 * bt * dt)
                + 2 * 4 * (d_state + 1) * dt)

    for dt in di_cands:                      # keep the lane tile as large as possible,
        for bt in bt_cands:                  # split batch before shrinking it.
            if footprint(bt, dt) <= budget:
                return bt, dt
    return bt_cands[-1], di_cands[-1]


# --------------------------------------------------------------------------------------
# Forward wrapper
# --------------------------------------------------------------------------------------
def state_space_rk4_forward(x, A, B, C, D, dt_proj, state=None, *,
                            state_layout="bdn", di_tile=None, batch_tile=None):
    """Forward pass of StateSpaceDiscreteRK4.  Returns (y, state).

    state_layout:
      "bdn" — module layout (batch, d_inner, d_state)  [transposed once on entry]
      "bnd" — fast path (batch, d_state, d_inner)      [no transpose; preferred for a
                                                         persistent recurrent state]
    """
    batch, d_inner = x.shape
    d_state = A.shape[1]
    out_dtype = x.dtype

    # Batch-independent fused coefficients (computed once, f32).
    P, q = _rk4_output_coefficients(A, B, C, D, dt_proj)

    if state is None:
        # Module-default path: state is all zeros and returned unchanged, so
        # y = q * x exactly — no kernel launch, no zero-state HBM traffic.
        y = (x.astype(jnp.float32) * q[None, :]).astype(out_dtype)
        return y, jnp.zeros((batch, d_inner, d_state), dtype=out_dtype)

    if state_layout == "bnd":
        state_t = state                                   # (batch, d_state, d_inner)
    else:
        # TODO(synk): keep the persistent recurrent state stored in
        # (batch, d_state, d_inner) layout ("bnd") to avoid this full extra
        # HBM read+write of the dominant tensor on every step.
        state_t = jnp.transpose(state, (0, 2, 1))         # (batch, d_state, d_inner)

    P_t = P.T                                             # (d_state, d_inner), f32
    q2 = q[None, :]                                       # (1, d_inner), f32

    budget = _vmem_budget_bytes()
    auto_bt, auto_dt = _choose_tiles(
        batch, d_inner, d_state, jnp.dtype(state_t.dtype).itemsize, budget)
    dt_tile = di_tile if di_tile is not None else auto_dt
    bt_tile = batch_tile if batch_tile is not None else auto_bt
    assert d_inner % dt_tile == 0, "d_inner tile must divide d_inner"
    assert batch % bt_tile == 0, "batch tile must divide batch"

    grid = (batch // bt_tile, d_inner // dt_tile)

    y = pl.pallas_call(
        _rk4_ssm_kernel,
        out_shape=jax.ShapeDtypeStruct((batch, d_inner), out_dtype),
        grid=grid,
        in_specs=[
            pl.BlockSpec((bt_tile, d_state, dt_tile), lambda i, j: (i, 0, j)),  # state
            pl.BlockSpec((bt_tile, dt_tile), lambda i, j: (i, j)),              # x
            pl.BlockSpec((d_state, dt_tile), lambda i, j: (0, j)),              # P
            pl.BlockSpec((1, dt_tile), lambda i, j: (0, j)),                    # q
        ],
        out_specs=pl.BlockSpec((bt_tile, dt_tile), lambda i, j: (i, j)),
        compiler_params=pltpu.CompilerParams(
            dimension_semantics=("parallel", "parallel"),   # megacore-shardable
            vmem_limit_bytes=32 << 20),
    )(state_t, x, P_t, q2)
    return y, state


# --------------------------------------------------------------------------------------
# Pure-JAX reference (explicit RK4 stages, mirrors the PyTorch semantics)
# --------------------------------------------------------------------------------------
def _reference_forward(x, A, B, C, D, dt_proj, state):
    dt = jax.nn.softplus(dt_proj)[None, :, None]            # (1, d_inner, 1)
    Bx = B[None] * x[:, :, None]
    f = lambda h: A[None] * h + Bx
    k1 = f(state)
    k2 = f(state + 0.5 * dt * k1)
    k3 = f(state + 0.5 * dt * k2)
    k4 = f(state + dt * k3)
    new_state = state + dt / 6.0 * (k1 + 2 * k2 + 2 * k3 + k4)
    y = jnp.einsum('bdn,dn->bd', new_state, C) + D[None, :] * x
    return y


# --------------------------------------------------------------------------------------
# Self-test
# --------------------------------------------------------------------------------------
if __name__ == "__main__":
    key = jax.random.PRNGKey(0)

    def make_params(k, d_inner, d_state, dt_min=0.001, dt_max=0.1):
        kA, kB, kC, kD, kdt = jax.random.split(k, 5)
        A = jax.random.normal(kA, (d_inner, d_state), jnp.float32) / d_state
        B = jax.random.normal(kB, (d_inner, d_state), jnp.float32) / d_state
        C = jax.random.normal(kC, (d_inner, d_state), jnp.float32) / d_state
        D = jax.random.normal(kD, (d_inner,), jnp.float32)
        dt_proj = jnp.exp(
            jax.random.uniform(kdt, (d_inner,), jnp.float32)
            * (math.log(dt_max) - math.log(dt_min)) + math.log(dt_min))
        return A, B, C, D, dt_proj

    # ---- Test 1: module-default path (state=None) — no kernel, no zero traffic ----
    batch, d_inner, d_state = 2, 32, 16
    kp, kx, key = jax.random.split(key, 3)
    A, B, C, D, dt_proj = make_params(kp, d_inner, d_state)
    x = jax.random.normal(kx, (batch, d_inner), jnp.float32)

    y1, st1 = state_space_rk4_forward(x, A, B, C, D, dt_proj)
    y1 = jax.block_until_ready(y1)
    st1 = jax.block_until_ready(st1)
    y1_ref = _reference_forward(
        x, A, B, C, D, dt_proj, jnp.zeros((batch, d_inner, d_state), jnp.float32))
    assert y1.shape == (batch, d_inner)
    assert st1.shape == (batch, d_inner, d_state)
    assert jnp.allclose(y1, y1_ref, atol=2e-5, rtol=1e-5), "test1 mismatch vs reference"

    # ---- Test 2: non-zero state, module ("bdn") layout, grid over d_inner ----------
    batch, d_inner, d_state = 2, 256, 16
    kp, kx, ks, key = jax.random.split(key, 4)
    A, B, C, D, dt_proj = make_params(kp, d_inner, d_state)
    x = jax.random.normal(kx, (batch, d_inner), jnp.float32)
    state = jax.random.normal(ks, (batch, d_inner, d_state), jnp.float32)

    y2, st2 = state_space_rk4_forward(x, A, B, C, D, dt_proj, state)   # grid = (1, 2)
    y2 = jax.block_until_ready(y2)
    y2_ref = _reference_forward(x, A, B, C, D, dt_proj, state)
    assert y2.shape == (batch, d_inner)
    assert jnp.allclose(y2, y2_ref, atol=2e-5, rtol=1e-5), "test2 mismatch vs reference"
    assert jnp.array_equal(st2, state), "module must return the original state"

    # ---- Test 3: transpose-free fast path ("bnd" persistent-state layout) ----------
    batch3 = 8
    kx3, ks3, key = jax.random.split(key, 3)
    x3 = jax.random.normal(kx3, (batch3, d_inner), jnp.float32)
    state3 = jax.random.normal(ks3, (batch3, d_inner, d_state), jnp.float32)
    state3_bnd = jnp.transpose(state3, (0, 2, 1))          # caller keeps it in this layout

    y3, _ = state_space_rk4_forward(x3, A, B, C, D, dt_proj, state3_bnd,
                                    state_layout="bnd")
    y3 = jax.block_until_ready(y3)
    y3_ref = _reference_forward(x3, A, B, C, D, dt_proj, state3)
    assert jnp.allclose(y3, y3_ref, atol=2e-5, rtol=1e-5), "test3 mismatch vs reference"

    print("KERNEL_OK")
</pallas_src>

<mosaic_0001>
module attributes {stable_mosaic.version = 11 : i64} {
  func.func @_rk4_ssm_kernel(%arg0: i32, %arg1: i32, %arg2: memref<2x16x128xf32, #tpu.memory_space<vmem>>, %arg3: memref<2x128xf32, #tpu.memory_space<vmem>>, %arg4: memref<16x128xf32, #tpu.memory_space<vmem>>, %arg5: memref<1x128xf32, #tpu.memory_space<vmem>>, %arg6: memref<2x128xf32, #tpu.memory_space<vmem>>) attributes {dimension_semantics = [#tpu.dimension_semantics<parallel>, #tpu.dimension_semantics<parallel>], iteration_bounds = array<i64: 1, 2>, scalar_prefetch = 0 : i64, scratch_operands = 0 : i64, tpu.core_type = #tpu.core_type<tc>, window_params = [{transform_indices = @transform_0, window_bounds = array<i64: 2, 16, 128>}, {transform_indices = @transform_1, window_bounds = array<i64: 2, 128>}, {transform_indices = @transform_2, window_bounds = array<i64: 16, 128>}, {transform_indices = @transform_3, window_bounds = array<i64: 1, 128>}, {transform_indices = @transform_4, window_bounds = array<i64: 2, 128>}]} {
    %c0 = arith.constant 0 : index
    %c0_0 = arith.constant 0 : index
    %0 = vector.load %arg3[%c0, %c0_0] : memref<2x128xf32, #tpu.memory_space<vmem>>, vector<2x128xf32>
    %c0_1 = arith.constant 0 : index
    %c0_2 = arith.constant 0 : index
    %1 = vector.load %arg5[%c0_1, %c0_2] : memref<1x128xf32, #tpu.memory_space<vmem>>, vector<1x128xf32>
    %2 = vector.broadcast %1 : vector<1x128xf32> to vector<2x128xf32>
    %3 = arith.mulf %0, %2 : vector<2x128xf32>
    %c0_3 = arith.constant 0 : index
    %c0_4 = arith.constant 0 : index
    %c0_5 = arith.constant 0 : index
    %4 = vector.load %arg2[%c0_3, %c0_4, %c0_5] : memref<2x16x128xf32, #tpu.memory_space<vmem>>, vector<2x1x128xf32>
    %5 = vector.shape_cast %4 : vector<2x1x128xf32> to vector<2x128xf32>
    %c0_6 = arith.constant 0 : index
    %c0_7 = arith.constant 0 : index
    %6 = vector.load %arg4[%c0_6, %c0_7] : memref<16x128xf32, #tpu.memory_space<vmem>>, vector<1x128xf32>
    %7 = vector.shape_cast %6 : vector<1x128xf32> to vector<128xf32>
    %8 = vector.shape_cast %7 : vector<128xf32> to vector<1x128xf32>
    %9 = vector.broadcast %8 : vector<1x128xf32> to vector<2x128xf32>
    %10 = arith.mulf %5, %9 : vector<2x128xf32>
    %11 = arith.addf %3, %10 : vector<2x128xf32>
    %c0_8 = arith.constant 0 : index
    %c1 = arith.constant 1 : index
    %c0_9 = arith.constant 0 : index
    %12 = vector.load %arg2[%c0_8, %c1, %c0_9] : memref<2x16x128xf32, #tpu.memory_space<vmem>>, vector<2x1x128xf32>
    %13 = vector.shape_cast %12 : vector<2x1x128xf32> to vector<2x128xf32>
    %c1_10 = arith.constant 1 : index
    %c0_11 = arith.constant 0 : index
    %14 = vector.load %arg4[%c1_10, %c0_11] : memref<16x128xf32, #tpu.memory_space<vmem>>, vector<1x128xf32>
    %15 = vector.shape_cast %14 : vector<1x128xf32> to vector<128xf32>
    %16 = vector.shape_cast %15 : vector<128xf32> to vector<1x128xf32>
    %17 = vector.broadcast %16 : vector<1x128xf32> to vector<2x128xf32>
    %18 = arith.mulf %13, %17 : vector<2x128xf32>
    %19 = arith.addf %11, %18 : vector<2x128xf32>
    %c0_12 = arith.constant 0 : index
    %c2 = arith.constant 2 : index
    %c0_13 = arith.constant 0 : index
    %20 = vector.load %arg2[%c0_12, %c2, %c0_13] : memref<2x16x128xf32, #tpu.memory_space<vmem>>, vector<2x1x128xf32>
    %21 = vector.shape_cast %20 : vector<2x1x128xf32> to vector<2x128xf32>
    %c2_14 = arith.constant 2 : index
    %c0_15 = arith.constant 0 : index
    %22 = vector.load %arg4[%c2_14, %c0_15] : memref<16x128xf32, #tpu.memory_space<vmem>>, vector<1x128xf32>
    %23 = vector.shape_cast %22 : vector<1x128xf32> to vector<128xf32>
    %24 = vector.shape_cast %23 : vector<128xf32> to vector<1x128xf32>
    %25 = vector.broadcast %24 : vector<1x128xf32> to vector<2x128xf32>
    %26 = arith.mulf %21, %25 : vector<2x128xf32>
    %27 = arith.addf %19, %26 : vector<2x128xf32>
    %c0_16 = arith.constant 0 : index
    %c3 = arith.constant 3 : index
    %c0_17 = arith.constant 0 : index
    %28 = vector.load %arg2[%c0_16, %c3, %c0_17] : memref<2x16x128xf32, #tpu.memory_space<vmem>>, vector<2x1x128xf32>
    %29 = vector.shape_cast %28 : vector<2x1x128xf32> to vector<2x128xf32>
    %c3_18 = arith.constant 3 : index
    %c0_19 = arith.constant 0 : index
    %30 = vector.load %arg4[%c3_18, %c0_19] : memref<16x128xf32, #tpu.memory_space<vmem>>, vector<1x128xf32>
    %31 = vector.shape_cast %30 : vector<1x128xf32> to vector<128xf32>
    %32 = vector.shape_cast %31 : vector<128xf32> to vector<1x128xf32>
    %33 = vector.broadcast %32 : vector<1x128xf32> to vector<2x128xf32>
    %34 = arith.mulf %29, %33 : vector<2x128xf32>
    %35 = arith.addf %27, %34 : vector<2x128xf32>
    %c0_20 = arith.constant 0 : index
    %c4 = arith.constant 4 : index
    %c0_21 = arith.constant 0 : index
    %36 = vector.load %arg2[%c0_20, %c4, %c0_21] : memref<2x16x128xf32, #tpu.memory_space<vmem>>, vector<2x1x128xf32>
    %37 = vector.shape_cast %36 : vector<2x1x128xf32> to vector<2x128xf32>
    %c4_22 = arith.constant 4 : index
    %c0_23 = arith.constant 0 : index
    %38 = vector.load %arg4[%c4_22, %c0_23] : memref<16x128xf32, #tpu.memory_space<vmem>>, vector<1x128xf32>
    %39 = vector.shape_cast %38 : vector<1x128xf32> to vector<128xf32>
    %40 = vector.shape_cast %39 : vector<128xf32> to vector<1x128xf32>
    %41 = vector.broadcast %40 : vector<1x128xf32> to vector<2x128xf32>
    %42 = arith.mulf %37, %41 : vector<2x128xf32>
    %43 = arith.addf %35, %42 : vector<2x128xf32>
    %c0_24 = arith.constant 0 : index
    %c5 = arith.constant 5 : index
    %c0_25 = arith.constant 0 : index
    %44 = vector.load %arg2[%c0_24, %c5, %c0_25] : memref<2x16x128xf32, #tpu.memory_space<vmem>>, vector<2x1x128xf32>
    %45 = vector.shape_cast %44 : vector<2x1x128xf32> to vector<2x128xf32>
    %c5_26 = arith.constant 5 : index
    %c0_27 = arith.constant 0 : index
    %46 = vector.load %arg4[%c5_26, %c0_27] : memref<16x128xf32, #tpu.memory_space<vmem>>, vector<1x128xf32>
    %47 = vector.shape_cast %46 : vector<1x128xf32> to vector<128xf32>
    %48 = vector.shape_cast %47 : vector<128xf32> to vector<1x128xf32>
    %49 = vector.broadcast %48 : vector<1x128xf32> to vector<2x128xf32>
    %50 = arith.mulf %45, %49 : vector<2x128xf32>
    %51 = arith.addf %43, %50 : vector<2x128xf32>
    %c0_28 = arith.constant 0 : index
    %c6 = arith.constant 6 : index
    %c0_29 = arith.constant 0 : index
    %52 = vector.load %arg2[%c0_28, %c6, %c0_29] : memref<2x16x128xf32, #tpu.memory_space<vmem>>, vector<2x1x128xf32>
    %53 = vector.shape_cast %52 : vector<2x1x128xf32> to vector<2x128xf32>
    %c6_30 = arith.constant 6 : index
    %c0_31 = arith.constant 0 : index
    %54 = vector.load %arg4[%c6_30, %c0_31] : memref<16x128xf32, #tpu.memory_space<vmem>>, vector<1x128xf32>
    %55 = vector.shape_cast %54 : vector<1x128xf32> to vector<128xf32>
    %56 = vector.shape_cast %55 : vector<128xf32> to vector<1x128xf32>
    %57 = vector.broadcast %56 : vector<1x128xf32> to vector<2x128xf32>
    %58 = arith.mulf %53, %57 : vector<2x128xf32>
    %59 = arith.addf %51, %58 : vector<2x128xf32>
    %c0_32 = arith.constant 0 : index
    %c7 = arith.constant 7 : index
    %c0_33 = arith.constant 0 : index
    %60 = vector.load %arg2[%c0_32, %c7, %c0_33] : memref<2x16x128xf32, #tpu.memory_space<vmem>>, vector<2x1x128xf32>
    %61 = vector.shape_cast %60 : vector<2x1x128xf32> to vector<2x128xf32>
    %c7_34 = arith.constant 7 : index
    %c0_35 = arith.constant 0 : index
    %62 = vector.load %arg4[%c7_34, %c0_35] : memref<16x128xf32, #tpu.memory_space<vmem>>, vector<1x128xf32>
    %63 = vector.shape_cast %62 : vector<1x128xf32> to vector<128xf32>
    %64 = vector.shape_cast %63 : vector<128xf32> to vector<1x128xf32>
    %65 = vector.broadcast %64 : vector<1x128xf32> to vector<2x128xf32>
    %66 = arith.mulf %61, %65 : vector<2x128xf32>
    %67 = arith.addf %59, %66 : vector<2x128xf32>
    %c0_36 = arith.constant 0 : index
    %c8 = arith.constant 8 : index
    %c0_37 = arith.constant 0 : index
    %68 = vector.load %arg2[%c0_36, %c8, %c0_37] : memref<2x16x128xf32, #tpu.memory_space<vmem>>, vector<2x1x128xf32>
    %69 = vector.shape_cast %68 : vector<2x1x128xf32> to vector<2x128xf32>
    %c8_38 = arith.constant 8 : index
    %c0_39 = arith.constant 0 : index
    %70 = vector.load %arg4[%c8_38, %c0_39] : memref<16x128xf32, #tpu.memory_space<vmem>>, vector<1x128xf32>
    %71 = vector.shape_cast %70 : vector<1x128xf32> to vector<128xf32>
    %72 = vector.shape_cast %71 : vector<128xf32> to vector<1x128xf32>
    %73 = vector.broadcast %72 : vector<1x128xf32> to vector<2x128xf32>
    %74 = arith.mulf %69, %73 : vector<2x128xf32>
    %75 = arith.addf %67, %74 : vector<2x128xf32>
    %c0_40 = arith.constant 0 : index
    %c9 = arith.constant 9 : index
    %c0_41 = arith.constant 0 : index
    %76 = vector.load %arg2[%c0_40, %c9, %c0_41] : memref<2x16x128xf32, #tpu.memory_space<vmem>>, vector<2x1x128xf32>
    %77 = vector.shape_cast %76 : vector<2x1x128xf32> to vector<2x128xf32>
    %c9_42 = arith.constant 9 : index
    %c0_43 = arith.constant 0 : index
    %78 = vector.load %arg4[%c9_42, %c0_43] : memref<16x128xf32, #tpu.memory_space<vmem>>, vector<1x128xf32>
    %79 = vector.shape_cast %78 : vector<1x128xf32> to vector<128xf32>
    %80 = vector.shape_cast %79 : vector<128xf32> to vector<1x128xf32>
    %81 = vector.broadcast %80 : vector<1x128xf32> to vector<2x128xf32>
    %82 = arith.mulf %77, %81 : vector<2x128xf32>
    %83 = arith.addf %75, %82 : vector<2x128xf32>
    %c0_44 = arith.constant 0 : index
    %c10 = arith.constant 10 : index
    %c0_45 = arith.constant 0 : index
    %84 = vector.load %arg2[%c0_44, %c10, %c0_45] : memref<2x16x128xf32, #tpu.memory_space<vmem>>, vector<2x1x128xf32>
    %85 = vector.shape_cast %84 : vector<2x1x128xf32> to vector<2x128xf32>
    %c10_46 = arith.constant 10 : index
    %c0_47 = arith.constant 0 : index
    %86 = vector.load %arg4[%c10_46, %c0_47] : memref<16x128xf32, #tpu.memory_space<vmem>>, vector<1x128xf32>
    %87 = vector.shape_cast %86 : vector<1x128xf32> to vector<128xf32>
    %88 = vector.shape_cast %87 : vector<128xf32> to vector<1x128xf32>
    %89 = vector.broadcast %88 : vector<1x128xf32> to vector<2x128xf32>
    %90 = arith.mulf %85, %89 : vector<2x128xf32>
    %91 = arith.addf %83, %90 : vector<2x128xf32>
    %c0_48 = arith.constant 0 : index
    %c11 = arith.constant 11 : index
    %c0_49 = arith.constant 0 : index
    %92 = vector.load %arg2[%c0_48, %c11, %c0_49] : memref<2x16x128xf32, #tpu.memory_space<vmem>>, vector<2x1x128xf32>
    %93 = vector.shape_cast %92 : vector<2x1x128xf32> to vector<2x128xf32>
    %c11_50 = arith.constant 11 : index
    %c0_51 = arith.constant 0 : index
    %94 = vector.load %arg4[%c11_50, %c0_51] : memref<16x128xf32, #tpu.memory_space<vmem>>, vector<1x128xf32>
    %95 = vector.shape_cast %94 : vector<1x128xf32> to vector<128xf32>
    %96 = vector.shape_cast %95 : vector<128xf32> to vector<1x128xf32>
    %97 = vector.broadcast %96 : vector<1x128xf32> to vector<2x128xf32>
    %98 = arith.mulf %93, %97 : vector<2x128xf32>
    %99 = arith.addf %91, %98 : vector<2x128xf32>
    %c0_52 = arith.constant 0 : index
    %c12 = arith.constant 12 : index
    %c0_53 = arith.constant 0 : index
    %100 = vector.load %arg2[%c0_52, %c12, %c0_53] : memref<2x16x128xf32, #tpu.memory_space<vmem>>, vector<2x1x128xf32>
    %101 = vector.shape_cast %100 : vector<2x1x128xf32> to vector<2x128xf32>
    %c12_54 = arith.constant 12 : index
    %c0_55 = arith.constant 0 : index
    %102 = vector.load %arg4[%c12_54, %c0_55] : memref<16x128xf32, #tpu.memory_space<vmem>>, vector<1x128xf32>
    %103 = vector.shape_cast %102 : vector<1x128xf32> to vector<128xf32>
    %104 = vector.shape_cast %103 : vector<128xf32> to vector<1x128xf32>
    %105 = vector.broadcast %104 : vector<1x128xf32> to vector<2x128xf32>
    %106 = arith.mulf %101, %105 : vector<2x128xf32>
    %107 = arith.addf %99, %106 : vector<2x128xf32>
    %c0_56 = arith.constant 0 : index
    %c13 = arith.constant 13 : index
    %c0_57 = arith.constant 0 : index
    %108 = vector.load %arg2[%c0_56, %c13, %c0_57] : memref<2x16x128xf32, #tpu.memory_space<vmem>>, vector<2x1x128xf32>
    %109 = vector.shape_cast %108 : vector<2x1x128xf32> to vector<2x128xf32>
    %c13_58 = arith.constant 13 : index
    %c0_59 = arith.constant 0 : index
    %110 = vector.load %arg4[%c13_58, %c0_59] : memref<16x128xf32, #tpu.memory_space<vmem>>, vector<1x128xf32>
    %111 = vector.shape_cast %110 : vector<1x128xf32> to vector<128xf32>
    %112 = vector.shape_cast %111 : vector<128xf32> to vector<1x128xf32>
    %113 = vector.broadcast %112 : vector<1x128xf32> to vector<2x128xf32>
    %114 = arith.mulf %109, %113 : vector<2x128xf32>
    %115 = arith.addf %107, %114 : vector<2x128xf32>
    %c0_60 = arith.constant 0 : index
    %c14 = arith.constant 14 : index
    %c0_61 = arith.constant 0 : index
    %116 = vector.load %arg2[%c0_60, %c14, %c0_61] : memref<2x16x128xf32, #tpu.memory_space<vmem>>, vector<2x1x128xf32>
    %117 = vector.shape_cast %116 : vector<2x1x128xf32> to vector<2x128xf32>
    %c14_62 = arith.constant 14 : index
    %c0_63 = arith.constant 0 : index
    %118 = vector.load %arg4[%c14_62, %c0_63] : memref<16x128xf32, #tpu.memory_space<vmem>>, vector<1x128xf32>
    %119 = vector.shape_cast %118 : vector<1x128xf32> to vector<128xf32>
    %120 = vector.shape_cast %119 : vector<128xf32> to vector<1x128xf32>
    %121 = vector.broadcast %120 : vector<1x128xf32> to vector<2x128xf32>
    %122 = arith.mulf %117, %121 : vector<2x128xf32>
    %123 = arith.addf %115, %122 : vector<2x128xf32>
    %c0_64 = arith.constant 0 : index
    %c15 = arith.constant 15 : index
    %c0_65 = arith.constant 0 : index
    %124 = vector.load %arg2[%c0_64, %c15, %c0_65] : memref<2x16x128xf32, #tpu.memory_space<vmem>>, vector<2x1x128xf32>
    %125 = vector.shape_cast %124 : vector<2x1x128xf32> to vector<2x128xf32>
    %c15_66 = arith.constant 15 : index
    %c0_67 = arith.constant 0 : index
    %126 = vector.load %arg4[%c15_66, %c0_67] : memref<16x128xf32, #tpu.memory_space<vmem>>, vector<1x128xf32>
    %127 = vector.shape_cast %126 : vector<1x128xf32> to vector<128xf32>
    %128 = vector.shape_cast %127 : vector<128xf32> to vector<1x128xf32>
    %129 = vector.broadcast %128 : vector<1x128xf32> to vector<2x128xf32>
    %130 = arith.mulf %125, %129 : vector<2x128xf32>
    %131 = arith.addf %123, %130 : vector<2x128xf32>
    %c0_68 = arith.constant 0 : index
    %c0_69 = arith.constant 0 : index
    %132 = vector.load %arg6[%c0_68, %c0_69] : memref<2x128xf32, #tpu.memory_space<vmem>>, vector<2x128xf32>
    tpu.vector_store %arg6[%c0_68, %c0_69], %131 {strides = array<i32>} : memref<2x128xf32, #tpu.memory_space<vmem>>, vector<2x128xf32>,
    return
  }
  func.func @transform_0(%arg0: i32, %arg1: i32) -> (i32, i32, i32) {
    %c0_i32 = arith.constant 0 : i32
    %c0_i32_0 = arith.constant 0 : i32
    return %arg0, %c0_i32, %arg1 : i32, i32, i32
  }
  func.func @transform_1(%arg0: i32, %arg1: i32) -> (i32, i32) {
    %c0_i32 = arith.constant 0 : i32
    return %arg0, %arg1 : i32, i32
  }
  func.func @transform_2(%arg0: i32, %arg1: i32) -> (i32, i32) {
    %c0_i32 = arith.constant 0 : i32
    %c0_i32_0 = arith.constant 0 : i32
    return %c0_i32, %arg1 : i32, i32
  }
  func.func @transform_3(%arg0: i32, %arg1: i32) -> (i32, i32) {
    %c0_i32 = arith.constant 0 : i32
    %c0_i32_0 = arith.constant 0 : i32
    return %c0_i32, %arg1 : i32, i32
  }
  func.func @transform_4(%arg0: i32, %arg1: i32) -> (i32, i32) {
    %c0_i32 = arith.constant 0 : i32
    return %arg0, %arg1 : i32, i32
  }
}

</mosaic_0001>

<bundles_post_ra>
// kernel: tpu_custom_call.1
= control target key start
LH: loop header
LB: loop body
LE: loop exit
PB: predicated region body
PF: predicated region fallthrough
CT: control target
= control target key end

     0   :  { %s1312_s0 = inlined_call_operand.hbm [shape: f32[2,16,256], index: 0, kind: input, shape index: {}]   ;;  %s1313_s1 = inlined_call_operand.hbm [shape: f32[2,256], index: 1, kind: input, shape index: {}]   ;;  %s1314_s2 = inlined_call_operand.hbm [shape: f32[16,256], index: 2, kind: input, shape index: {}]   ;;  %s1315_s3 = inlined_call_operand.vmem [shape: f32[1,256], index: 3, kind: input, shape index: {}]   ;;  %s1316_s4 = inlined_call_operand.hbm [shape: f32[2,256], index: 4, kind: output, shape index: {}]  }
   0x1   :  { %1318 = sst [smem:[#allocation14_spill]] %s1313_s1 }
   0x2   :  { %1319 = sst [smem:[#allocation15_spill]] %s1314_s2 }
   0x3   :  { %9 = vsyncpa [#allocation3], 0 }
   0x4   :  { %11 = vsyncpa [#allocation3 + $0x1], 0 }
   0x5   :  { %12 = vsyncpa [#allocation6], 0 }
   0x6   :  { %14 = vsyncpa [#allocation6 + $0x1], 0 }
   0x7   :  { %15 = vsyncpa [#allocation4], 0 }
   0x8   :  { %17 = vsyncpa [#allocation4 + $0x1], 0  ;;  %s1042_s15 = smov 0   ;;  %s1044_s16 = smov 0  }
   0x9   :  { %s1046_s17 = smov 0   ;;  %s1048_s18 = smov 0  }
   0xa   :  { %s1050_s19 = smov 0   ;;  %s1052_s20 = smov 0  }
   0xb LB: > { %s1073_s21 = sadd.s32 4294967295, %s1008_s20   ;;  %s730_s22 = sadd.s32 4294967294, %s1008_s20   ;;  %s1008_s20 = sphi %s1052_s20, %s23_s20   ;;  %s1004_s19 = sphi %s1050_s19, %s1340_s19   ;;  %s1000_s18 = sphi %s1048_s18, %s1339_s18   ;;  %s996_s17 = sphi %s1046_s17, %s1338_s17   ;;  %s992_s16 = sphi %s1044_s16, %s1337_s16   ;;  %s988_s15 = sphi %s1042_s15, %s1336_s15  }
   0xc   : > { %s32_s23 = sadd.s32 1, %s1004_s19  ;;  %s44_s24 = sadd.s32 1, %s996_s17 }
   0xd   : > { %p33_p0 = scmp.ge.s32.totalorder %s32_s23, 2  ;;  %p51_p1 = scmp.ne.s32.totalorder %s996_s17, %s992_s16 }
   0xe   : > { %p52_p2 = scmp.eq.s32.totalorder %s1008_s20, 0  ;;  %p57_p3 = scmp.ne.s32.totalorder %s992_s16, %s988_s15 }
   0xf   : > { %s1342_s23 = smov (%p33_p0, %s32_s23), 0  ;;  %p58_p5 = scmp.eq.s32.totalorder %s1073_s21, 0 }
  0x10   : > { %1320 = sst [smem:[#allocation12_spill]] %s1342_s23  ;;  %p1085_p4 = por %p52_p2, %p51_p1 }
  0x11   : > { %s40_s26 = ssub.s32 %s1004_s19, %s1342_s23  ;;  %p163_p6 = scmp.eq.s32.totalorder %s1073_s21, 1 }
  0x12   : > { %p42_p7 = scmp.eq.s32.totalorder %s40_s26, 0  ;;  %p1093_p8 = por %p58_p5, %p57_p3 }
  0x13   : > { %p1097_p9 = por %p163_p6, %p51_p1  ;;  %p169_p10 = scmp.eq.s32.totalorder %s730_s22, 1 }
  0x14   : > { %s1102_s29 = scalar_select %p42_p7, %s996_s17, %s44_s24  }
  0x15   : > { %p1104_p11 = por %p169_p10, %p57_p3  ;;  %p787_p13 = scmp.lt.s32.totalorder %s1008_s20, 2 }
  0x16   : > { %1324 = sst [smem:[#allocation13_spill]] %s1102_s29  ;;  %s1111_s5 = sand.u32 1, %s996_s17  }
  0x17   : > { %p1117_p0 = pnand %p787_p13, %p1085_p4  ;;  %s212_s9 = sand.u32 1, %s1008_s20  }
  0x18   : > { %s735_s10 = sshll.u32 %s1111_s5, 1  ;;  %s736_s11 = sshll.u32 %s1004_s19, 5 }
  0x19   : > { %s216_s12 = scalar_lea.vmem [#allocation5], %s735_s10  ;;  %s1327_s1 = sld [smem:[#allocation14_spill]] }
  0x1a   : > { %s225_s13 = sshll.u32 %s216_s12, 4  ;;  %s1127_s26 = scalar_lea.sflag [#allocation6], %s212_s9  ;;  %s226_s13 = int_to_ptr.vmem [resolvable:$true] %s225_s13 }
  0x1b   : > { %p842_p1 = pneg %p1117_p0  ;;  %s853_s25 = scalar_lea.vmem %s226_s13, 32 }
  0x1c   : > { %p854_p2 = scmp.ne.s32.totalorder %s226_s13, %s853_s25  ;;  %s1010_s6 = smov [#allocation5]  }
  0x1d   : > { %s858_s7 = sshll.u32 %s1010_s6, 4  ;;  %s859_s7 = int_to_ptr.vmem [resolvable:$false] %s858_s7 }
  0x1e   : > { %p856_p3 = pnand %p854_p2, %p842_p1  ;;  %s860_s10 = scalar_lea.vmem %s859_s7, 64 }
  0x1f   : > { %s223_s24 = scalar_lea.hbm %s1327_s1, %s736_s11  ;;  %p861_p5 = scmp.lt.s32.totalorder %s226_s13, %s859_s7 }
  0x20   : > { %p857_p4 = pneg %p856_p3  ;;  %p862_p6 = scmp.lt.s32.totalorder %s860_s10, %s853_s25 }
  0x22   : > { %p863_p7 = por %p862_p6, %p861_p5 }
  0x24   : > { %p864_p10 = pnand %p863_p7, %p857_p4 }
  0x26   : > { %867 = shalt.err (!%p864_p10)
}
  0x27   : > { %779 = dma.hbm_to_vmem [thread:$0]  (!%p1117_p0), %s223_s24, 32, %s226_s13, %s1127_s26  }
  0x28   : > { %s737_s6 = sshll.u32 %s1111_s5, 4  ;;  %s1328_s9 = sshll.u32 %s1004_s19, 7 }
  0x29   : > { %s1329_s2 = sld [smem:[#allocation15_spill]]  ;;  %p739_p13 = scmp.ge.s32.totalorder %s1008_s20, 1 }
  0x2a   : > { %s236_s14 = scalar_lea.vmem [#allocation7], %s737_s6  ;;  %p256_p2 = scmp.lt.s32.totalorder %s1008_s20, 3 }
  0x2b   : > { %s242_s22 = sshll.u32 %s236_s14, 4  ;;  %s1331_s10 = smov %s1328_s9  ;;  %s1147_s22 = int_to_ptr.vmem [resolvable:$true] %s242_s22 }
  0x2c   : > { %p1149_p3 = pnand %p739_p13, %p256_p2  ;;  %s201_s1 = scalar_lea.hbm %s1312_s0, %s1331_s10 }
  0x2d   : > { %s1332_s23 = sshll.u32 %s1111_s5, 5  ;;  %s1011_s6 = smov [#allocation2]  }
  0x2e   : > { %s193_s29 = scalar_lea.vmem [#allocation2], %s1332_s23  ;;  %s886_s14 = sshll.u32 %s1011_s6, 4  ;;  %s887_s14 = int_to_ptr.vmem [resolvable:$false] %s886_s14 }
  0x2f   : > { %s1143_s12 = scalar_lea.hbm %s1329_s2, %s1328_s9  ;;  %s202_s11 = sshll.u32 %s193_s29, 4  ;;  %s203_s11 = int_to_ptr.vmem [resolvable:$true] %s202_s11 }
  0x30   : > { %s190_s9 = scalar_lea.sflag [#allocation3], %s1111_s5  ;;  %s881_s7 = scalar_lea.vmem %s203_s11, 512 }
  0x31   : > { %p882_p4 = scmp.ne.s32.totalorder %s203_s11, %s881_s7  ;;  %s888_s2 = scalar_lea.vmem %s887_s14, 1024 }
  0x32   : > { %p889_p7 = scmp.lt.s32.totalorder %s203_s11, %s887_s14  ;;  %p890_p10 = scmp.lt.s32.totalorder %s888_s2, %s881_s7 }
  0x33   : > { %p884_p5 = pnand %p882_p4, %p842_p1 }
  0x34   : > { %p891_p13 = por %p890_p10, %p889_p7 }
  0x35   : > { %p885_p6 = pneg %p884_p5 }
  0x37   : > { %p892_p2 = pnand %p891_p13, %p885_p6 }
  0x39   : > { %895 = shalt.err (!%p892_p2)
}
  0x3a   : > { %s1012_s10 = smov 256   ;;  %s1013_s23 = smov 128  }
  0x3b   : > { %s1014_s29 = smov 8   ;;  %s909_s5 = scalar_lea.vmem %s1147_s22, 256 }
  0x3c   : > { %776 = dma.hbm_to_vmem [thread:$0]  (!%p1117_p0), %s201_s1, 512, %s203_s11, %s190_s9, %s1012_s10, %s1013_s23, %s1014_s29  }
  0x3d   : > { %p910_p4 = scmp.ne.s32.totalorder %s1147_s22, %s909_s5  ;;  %s1015_s2 = smov [#allocation7]  }
  0x3e   : > { %s914_s13 = sshll.u32 %s1015_s2, 4  ;;  %s915_s13 = int_to_ptr.vmem [resolvable:$false] %s914_s13 }
  0x3f   : > { %p912_p5 = pnand %p910_p4, %p842_p1  ;;  %s916_s24 = scalar_lea.vmem %s915_s13, 512 }
  0x40   : > { %p917_p6 = scmp.lt.s32.totalorder %s1147_s22, %s915_s13  ;;  %p918_p7 = scmp.lt.s32.totalorder %s916_s24, %s909_s5 }
  0x41   : > { %p913_p12 = pneg %p912_p5 }
  0x42   : > { %p919_p10 = por %p918_p7, %p917_p6 }
  0x44   : > { %p920_p13 = pnand %p919_p10, %p913_p12 }
  0x46   : > { %923 = shalt.err (!%p920_p13)
}
  0x47   : > { %782 = dma.hbm_to_vmem [thread:$0]  (!%p1117_p0), %s1143_s12, 256, %s1147_s22, %s1127_s26, %s1012_s10, %s1013_s23, %s1014_s29  }
  0x48   : > { %260 = sbr.rel (%p1149_p3) target bundleno = 134 (0x86), region = 36  ;;  %s1180_s1 = sand.u32 (!%p1149_p3), 1, %s992_s16  }
  0x49   : > { %s740_s11 = sshll.u32 (!%p1149_p3), %s1180_s1, 5  ;;  %s263_s9 = scalar_lea.sflag (!%p1149_p3), [#allocation3], %s1180_s1 }
  0x4a   : > { %s1184_s7 = scalar_lea.vmem (!%p1149_p3), [#allocation2], %s740_s11 }
  0x4d   : > { %975 = dma.done.wait (%p1093_p8), %s263_s9, 512  }
  0x4e   : > { %977 = vsyncadd (%p1093_p8), %s263_s9, 4294966784  ;;  %s271_s8 = sand.u32 1, %s1073_s21   ;;  %s741_s26 = sshll.u32 %s1180_s1, 1 }
  0x4f   : > { %s272_s12 = scalar_lea.sflag [#allocation6], %s271_s8  ;;  %s275_s22 = scalar_lea.vmem [#allocation5], %s741_s26 }
  0x50   : > { %979 = dma.done.wait (%p1093_p8), %s272_s12, 288  }
  0x51   : > { %981 = vsyncadd (%p1093_p8), %s272_s12, 4294967008  ;;  %p323_p12 = scmp.lt.s32.totalorder %s1000_s18, 1  ;;  %s742_s25 = sshll.u32 %s1180_s1, 4  ;;  %vm347_vm0 = vcmask 1041409   ;;  %v326_v0 = vld [vmem:[%s275_s22] sm:$0x3] }
  0x52   : > { %v335_v2 = vld [vmem:[%s1184_s7] sm:$0x1]  ;;  %v336_v3 = vld [vmem:[%s1184_s7 + $0x10] sm:$0x1]  ;;  %s1206_s27 = scalar_lea.vmem [#allocation7], %s742_s25  ;;  %s321_s23 = scalar_lea.vmem [#allocation8], %s741_s26 }
  0x53   : > { %s324_s21 = scalar_select %p323_p12, %s1000_s18, 1  ;;  %v745_v4 = vld [vmem:[%s1206_s27] ss:$0 sm:$0xff]  ;;  %v351_v5 = vld [vmem:[%s1184_s7 + $0x1] sm:$0x1] }
  0x54   : > { %v342_v6 = vmul.f32 %v745_v4, %v335_v2  ;;  %v343_v7 = vmul.f32 %v745_v4, %v336_v3  ;;  %v352_v8 = vld [vmem:[%s1184_s7 + $0x11] sm:$0x1]  ;;  %v746_v9 = vld [vmem:[%s1206_s27 + $0x1] ss:$0 sm:$0xff]  ;;  %v366_v10 = vld [vmem:[%s1184_s7 + $0x2] sm:$0x1] }
  0x55   : > { %s325_s10 = scalar_lea.vmem %s1315_s3, %s324_s21  ;;  %v358_v12 = vmul.f32 %v746_v9, %v351_v5  ;;  %v359_v13 = vmul.f32 %v746_v9, %v352_v8  ;;  %v367_v14 = vld [vmem:[%s1184_s7 + $0x12] sm:$0x1]  ;;  %v747_v15 = vld [vmem:[%s1206_s27 + $0x2] ss:$0 sm:$0xff]  ;;  %v381_v16 = vld [vmem:[%s1184_s7 + $0x3] sm:$0x1] }
  0x56   : > { %v744_v1 = vld [vmem:[%s325_s10] ss:$0 sm:$0xff]  ;;  %v346_v17 = vrot.slane %v343_v7, 7  ;;  %v373_v18 = vmul.f32 %v747_v15, %v366_v10  ;;  %v374_v19 = vmul.f32 %v747_v15, %v367_v14  ;;  %v382_v20 = vld [vmem:[%s1184_s7 + $0x13] sm:$0x1]  ;;  %s593_s29 = sshll.u32 %s321_s23, 4  ;;  %s594_s29 = int_to_ptr.vmem [resolvable:$true] %s593_s29 }
  0x57   : > { %v334_v11 = vmul.f32 %v744_v1, %v326_v0  ;;  %v748_v21 = vld [vmem:[%s1206_s27 + $0x3] ss:$0 sm:$0xff]  ;;  %v362_v22 = vrot.slane %v359_v13, 7  ;;  %v396_v24 = vld [vmem:[%s1184_s7 + $0x4] sm:$0x1]  ;;  %s762_s5 = sshll.u32 %s1000_s18, 5 }
  0x58   : > { %v389_v23 = vmul.f32 %v748_v21, %v382_v20  ;;  %v397_v25 = vld [vmem:[%s1184_s7 + $0x14] sm:$0x1]  ;;  %v348_v26 = vsel %vm347_vm0, %v346_v17, %v342_v6  ;;  %v377_v27 = vrot.slane %v374_v19, 7  ;;  %v388_v28 = vmul.f32 %v748_v21, %v381_v16  ;;  %v749_v29 = vld [vmem:[%s1206_s27 + $0x4] ss:$0 sm:$0xff]  ;;  %s591_s24 = scalar_lea.hbm %s1316_s4, %s762_s5  ;;  %s578_s11 = scalar_lea.sflag [#allocation4], %s1180_s1 }
  0x59   : > { %v411_v30 = vld [vmem:[%s1184_s7 + $0x5] sm:$0x1]  ;;  %v350_v31 = vadd.f32 %v348_v26, %v334_v11  ;;  %v363_v32 = vsel %vm347_vm0, %v362_v22, %v358_v12  ;;  %v412_v34 = vld [vmem:[%s1184_s7 + $0x15] sm:$0x1]  ;;  %v750_v35 = vld [vmem:[%s1206_s27 + $0x5] ss:$0 sm:$0xff]  ;;  %v403_v37 = vmul.f32 %v749_v29, %v396_v24  ;;  %v404_v38 = vmul.f32 %v749_v29, %v397_v25 }
  0x5a   : > { %v392_v33 = vrot.slane %v389_v23, 7  ;;  %v378_v36 = vsel %vm347_vm0, %v377_v27, %v373_v18  ;;  %v419_v39 = vmul.f32 %v750_v35, %v412_v34  ;;  %v427_v40 = vld [vmem:[%s1184_s7 + $0x16] sm:$0x1]  ;;  %v751_v41 = vld [vmem:[%s1206_s27 + $0x6] ss:$0 sm:$0xff]  ;;  %v418_v43 = vmul.f32 %v750_v35, %v411_v30  ;;  %s924_s9 = scalar_lea.vmem %s594_s29, 32 }
  0x5b   : > { %v365_v42 = vadd.f32 %v363_v32, %v350_v31  ;;  %v426_v44 = vld [vmem:[%s1184_s7 + $0x6] sm:$0x1]  ;;  %v434_v45 = vmul.f32 %v751_v41, %v427_v40  ;;  %v442_v46 = vld [vmem:[%s1184_s7 + $0x17] sm:$0x1]  ;;  %v752_v47 = vld [vmem:[%s1206_s27 + $0x7] ss:$0 sm:$0xff]  ;;  %p925_p8 = scmp.ne.s32.totalorder %s594_s29, %s924_s9 }
  0x5c   : > { %v393_v48 = vsel %vm347_vm0, %v392_v33, %v388_v28  ;;  %v407_v49 = vrot.slane %v404_v38, 7  ;;  %v422_v50 = vrot.slane %v419_v39, 7  ;;  %v449_v51 = vmul.f32 %v752_v47, %v442_v46  ;;  %v457_v52 = vld [vmem:[%s1184_s7 + $0x18] sm:$0x1]  ;;  %v441_v54 = vld [vmem:[%s1184_s7 + $0x7] sm:$0x1] }
  0x5d   : > { %v380_v53 = vadd.f32 %v378_v36, %v365_v42  ;;  %v753_v55 = vld [vmem:[%s1206_s27 + $0x8] ss:$0 sm:$0xff]  ;;  %v433_v57 = vmul.f32 %v751_v41, %v426_v44  ;;  %v437_v58 = vrot.slane %v434_v45, 7  ;;  %v472_v59 = vld [vmem:[%s1184_s7 + $0x19] sm:$0x1]  ;;  %v448_v3 = vmul.f32 %v752_v47, %v441_v54  ;;  %p926_p0 = pnand %p925_p8, %p1097_p9 }
  0x5e   : > { %v408_v56 = vsel %vm347_vm0, %v407_v49, %v403_v37  ;;  %v754_v60 = vld [vmem:[%s1206_s27 + $0x9] ss:$0 sm:$0xff]  ;;  %v456_v62 = vld [vmem:[%s1184_s7 + $0x8] sm:$0x1]  ;;  %v464_v63 = vmul.f32 %v753_v55, %v457_v52  ;;  %v487_v0 = vld [vmem:[%s1184_s7 + $0x1a] sm:$0x1]  ;;  %v423_v2 = vsel %vm347_vm0, %v422_v50, %v418_v43 }
  0x5f   : > { %v395_v61 = vadd.f32 %v393_v48, %v380_v53  ;;  %v755_v1 = vld [vmem:[%s1206_s27 + $0xa] ss:$0 sm:$0xff]  ;;  %v452_v4 = vrot.slane %v449_v51, 7  ;;  %v479_v5 = vmul.f32 %v754_v60, %v472_v59  ;;  %v471_v7 = vld [vmem:[%s1184_s7 + $0x9] sm:$0x1]  ;;  %v438_v10 = vsel %vm347_vm0, %v437_v58, %v433_v57  ;;  %p927_p1 = pneg %p926_p0 }
  0x60   : > { %v502_v8 = vld [vmem:[%s1184_s7 + $0x1b] sm:$0x1]  ;;  %v756_v9 = vld [vmem:[%s1206_s27 + $0xb] ss:$0 sm:$0xff]  ;;  %v463_v11 = vmul.f32 %v753_v55, %v456_v62  ;;  %v467_v12 = vrot.slane %v464_v63, 7  ;;  %v494_v13 = vmul.f32 %v755_v1, %v487_v0  ;;  %v478_v19 = vmul.f32 %v754_v60, %v471_v7 }
  0x61   : > { %v410_v6 = vadd.f32 %v408_v56, %v395_v61  ;;  %v486_v15 = vld [vmem:[%s1184_s7 + $0xa] sm:$0x1]  ;;  %v517_v16 = vld [vmem:[%s1184_s7 + $0x1c] sm:$0x1]  ;;  %v757_v17 = vld [vmem:[%s1206_s27 + $0xc] ss:$0 sm:$0xff]  ;;  %v453_v18 = vsel %vm347_vm0, %v452_v4, %v448_v3  ;;  %v509_v21 = vmul.f32 %v756_v9, %v502_v8 }
  0x62   : > { %v482_v20 = vrot.slane %v479_v5, 7  ;;  %v501_v23 = vld [vmem:[%s1184_s7 + $0xb] sm:$0x1]  ;;  %v532_v24 = vld [vmem:[%s1184_s7 + $0x1d] sm:$0x1]  ;;  %v468_v26 = vsel %vm347_vm0, %v467_v12, %v463_v11  ;;  %v493_v27 = vmul.f32 %v755_v1, %v486_v15  ;;  %v497_v28 = vrot.slane %v494_v13, 7 }
  0x63   : > { %v425_v14 = vadd.f32 %v423_v2, %v410_v6  ;;  %v758_v25 = vld [vmem:[%s1206_s27 + $0xd] ss:$0 sm:$0xff]  ;;  %v524_v29 = vmul.f32 %v757_v17, %v517_v16  ;;  %v516_v31 = vld [vmem:[%s1184_s7 + $0xc] sm:$0x1]  ;;  %v547_v32 = vld [vmem:[%s1184_s7 + $0x1e] sm:$0x1]  ;;  %v508_v35 = vmul.f32 %v756_v9, %v501_v23 }
  0x64   : > { %v759_v33 = vld [vmem:[%s1206_s27 + $0xe] ss:$0 sm:$0xff]  ;;  %v483_v34 = vsel %vm347_vm0, %v482_v20, %v478_v19  ;;  %v512_v36 = vrot.slane %v509_v21, 7  ;;  %v539_v37 = vmul.f32 %v758_v25, %v532_v24  ;;  %v531_v39 = vld [vmem:[%s1184_s7 + $0xd] sm:$0x1]  ;;  %v498_v42 = vsel %vm347_vm0, %v497_v28, %v493_v27 }
  0x65   : > { %v440_v22 = vadd.f32 %v438_v10, %v425_v14  ;;  %v562_v40 = vld [vmem:[%s1184_s7 + $0x1f] sm:$0x1]  ;;  %v760_v41 = vld [vmem:[%s1206_s27 + $0xf] ss:$0 sm:$0xff]  ;;  %v523_v43 = vmul.f32 %v757_v17, %v516_v31  ;;  %v527_v44 = vrot.slane %v524_v29, 7  ;;  %v554_v45 = vmul.f32 %v759_v33, %v547_v32 }
  0x66   : > { %v546_v47 = vld [vmem:[%s1184_s7 + $0xe] sm:$0x1]  ;;  %v513_v48 = vsel %vm347_vm0, %v512_v36, %v508_v35  ;;  %v538_v49 = vmul.f32 %v758_v25, %v531_v39  ;;  %v542_v50 = vrot.slane %v539_v37, 7  ;;  %v569_v51 = vmul.f32 %v760_v41, %v562_v40  ;;  %v561_v53 = vld [vmem:[%s1184_s7 + $0xf] sm:$0x1]  ;;  %s1016_s7 = smov [#allocation8]  }
  0x67   : > { %v455_v30 = vadd.f32 %v453_v18, %v440_v22  ;;  %v528_v54 = vsel %vm347_vm0, %v527_v44, %v523_v43  ;;  %v553_v55 = vmul.f32 %v759_v33, %v546_v47  ;;  %v557_v56 = vrot.slane %v554_v45, 7  ;;  %s928_s8 = sshll.u32 %s1016_s7, 4  ;;  %s929_s8 = int_to_ptr.vmem [resolvable:$false] %s928_s8 }
  0x68   : > { %v543_v58 = vsel %vm347_vm0, %v542_v50, %v538_v49  ;;  %v568_v59 = vmul.f32 %v760_v41, %v561_v53  ;;  %v572_v60 = vrot.slane %v569_v51, 7  ;;  %s930_s26 = scalar_lea.vmem %s929_s8, 64  ;;  %p931_p3 = scmp.lt.s32.totalorder %s594_s29, %s929_s8 }
  0x69   : > { %v470_v38 = vadd.f32 %v468_v26, %v455_v30  ;;  %v558_v62 = vsel %vm347_vm0, %v557_v56, %v553_v55  ;;  %p932_p2 = scmp.lt.s32.totalorder %s930_s26, %s924_s9 }
  0x6a   : > { %v573_v0 = vsel %vm347_vm0, %v572_v60, %v568_v59 }
  0x6b   : > { %v485_v46 = vadd.f32 %v483_v34, %v470_v38  ;;  %p933_p4 = por %p932_p2, %p931_p3 }
  0x6d   : > { %v500_v52 = vadd.f32 %v498_v42, %v485_v46  ;;  %p934_p5 = pnand %p933_p4, %p927_p1 }
  0x6f   : > { %v515_v57 = vadd.f32 %v513_v48, %v500_v52 }
  0x71   : > { %v530_v61 = vadd.f32 %v528_v54, %v515_v57 }
  0x73   : > { %v545_v63 = vadd.f32 %v543_v58, %v530_v61 }
  0x75   : > { %v560_v1 = vadd.f32 %v558_v62, %v545_v63 }
  0x77   : > { %v575_v2 = vadd.f32 %v573_v0, %v560_v1 }
  0x79   : > { %576 = vst [vmem:[%s321_s23] sm:$0x3] %v575_v2 }
  0x7a   : > { %937 = shalt.err (!%p934_p5)
}
  0x7b   : > { %s938_s18 = scalar_lea.hbm %s591_s24, 32  ;;  %s942_s22 = scalar_lea.hbm %s1316_s4, 64 }
  0x7c   : > { %p939_p6 = scmp.ne.s32.totalorder %s591_s24, %s938_s18  ;;  %p943_p13 = scmp.lt.s32.totalorder %s591_s24, %s1316_s4 }
  0x7d   : > { %p944_p12 = scmp.lt.s32.totalorder %s942_s22, %s938_s18 }
  0x7e   : > { %p940_p7 = pnand %p939_p6, %p1097_p9 }
  0x7f   : > { %p945_p8 = por %p944_p12, %p943_p13 }
  0x80   : > { %p941_p10 = pneg %p940_p7 }
  0x82   : > { %p946_p0 = pnand %p945_p8, %p941_p10 }
  0x84   : > { %949 = shalt.err (!%p946_p0)
}
  0x85   : > { %771 = dma.vmem_to_hbm [thread:$0]  (%p1097_p9), %s594_s29, 32, %s591_s24, %s578_s11  }
  0x86 PF: > { %s605_s6 = sand.u32 1, %s988_s15   ;;  %p1333_p1 = scmp.ge.s32.totalorder %s1008_s20, 2 }
  0x87   : > { %s606_s14 = scalar_lea.sflag [#allocation4], %s605_s6 }
  0x88   : > { %p784_p3 = pnand %p1333_p1, %p1104_p11 }
  0x8a   : > { %p785_p2 = pneg %p784_p3 }
  0x8c   : > { %983 = dma.done.wait (%p785_p2), %s606_s14, 32  }
  0x8d   : > { %985 = vsyncadd (%p785_p2), %s606_s14, 4294967264  ;;  %s23_s20 = sadd.s32 1, %s1008_s20   ;;  %s1334_s10 = sld [smem:[#allocation13_spill]] }
  0x8e   : > { %p20_p4 = scmp.ge.s32.totalorder %s23_s20, 4   ;;  %s1335_s28 = sld [smem:[#allocation12_spill]] }
  0x8f   : > { %s1336_s15 = smov %s992_s16  ;;  %s1337_s16 = smov %s996_s17 }
  0x90   : > { %s1339_s18 = smov %s1004_s19  ;;  %22 = sbr.rel (!%p20_p4) target bundleno = 11 (0xb), region = 108 }
  0x93   : > { %s1338_s17 = smov %s1334_s10 }
  0x94   : > { %s1340_s19 = smov %s1335_s28 }
  0x95   :  { %611 = vsyncpa [#allocation3], 1 }
  0x96   :  { %613 = vsyncpa [#allocation3 + $0x1], 1 }
  0x97   :  { %614 = vsyncpa [#allocation6], 1 }
  0x98   :  { %616 = vsyncpa [#allocation6 + $0x1], 1 }
  0x99   :  { %617 = vsyncpa [#allocation4], 1 }
  0x9a   :  { %619 = vsyncpa [#allocation4 + $0x1], 1 }

</bundles_post_ra>
